<compile_context>
chip_gen: v5e
topology: v5e:2x2
jax: 0.10.0
libtpu: 0.0.40
codegen_flags: <defaults>
</compile_context>

<pallas_src>
import jax
import jax.numpy as jnp
from jax.experimental import pallas as pl
from jax.experimental.pallas import tpu as pltpu


def nan_emb_kernel(x_ref, wb_ref, o_ref):
    # x_ref: (tp, pack*F); wb_ref: (2*pack*F, pack*O); o_ref: (tp, pack*O)
    x = x_ref[...]                                     # keep input dtype (no upcast)
    nan = jnp.isnan(x)
    xm = jnp.where(nan, jnp.zeros_like(x), x)          # NaN feature -> weight term vanishes
    m = jnp.where(nan, jnp.zeros_like(x), jnp.ones_like(x))  # NaN feature -> bias term vanishes
    # Single fused MXU pass: [xm | m] @ [kron(I, W/F) ; kron(I, B/F)]
    lhs = jnp.concatenate([xm, m], axis=-1)
    acc = jnp.dot(lhs, wb_ref[...], preferred_element_type=jnp.float32)
    o_ref[...] = acc.astype(o_ref.dtype)


def nan_emb(x, w, b, *, block_rows=None, out_dtype=jnp.float32):
    """x: (N, F), w/b: (F, O)  ->  (N, O) in out_dtype (default float32)."""
    N, F = x.shape
    O = w.shape[1]
    assert w.shape == (F, O) and b.shape == (F, O)

    # Lane packing factor: fold `pack` logical rows into one 128-lane output
    # row.  Guarded so the fused contraction dim 2*pack*F stays in one MXU pass
    # and the resident kron weights stay small.
    pack = 1
    if 0 < O < 128 and 128 % O == 0:
        pack = 128 // O
        while pack > 1 and pack * F > 128:
            pack //= 2

    Np = pl.cdiv(N, pack)                              # packed rows needed
    in_bytes = jnp.dtype(x.dtype).itemsize
    out_bytes = jnp.dtype(out_dtype).itemsize
    K = 2 * pack * F                                   # fused contraction dim

    # ---- generation-aware VMEM budget ------------------------------------
    try:
        vmem_cap = int(getattr(pltpu.get_tpu_info(), "vmem_capacity_bytes",
                               64 * 1024 * 1024))
    except Exception:
        vmem_cap = 64 * 1024 * 1024                    # v7x-safe fallback
    vmem_limit = (vmem_cap * 3) // 4                   # ~96 MiB v5e/v6e, ~48 MiB v7x
    budget = vmem_limit - (4 << 20)                    # headroom for compiler temps

    wb_bytes = 2 * K * pack * O * 4                    # resident fused W/B (double-buffered)

    def _footprint(t):
        return (2 * t * pack * F * in_bytes            # x tile, double-buffered
                + 2 * t * pack * O * out_bytes         # out tile, double-buffered
                + t * (pack * F * 16 + pack * O * 4)   # in-kernel f32 temporaries
                + wb_bytes)

    # ---- tile sizing: target ~8 MiB of HBM traffic per grid step ----------
    row_bytes = pack * F * in_bytes + pack * O * out_bytes
    if block_rows is None:
        tp = max(8, (8 << 20) // row_bytes)            # grow toward the budget
    else:
        tp = max(1, block_rows // pack)
    tp = min(tp, Np)
    while tp > 8 and _footprint(tp) > budget:          # shrink only if over budget
        tp //= 2
    if Np >= 16:
        # Keep >= 2 grid steps so the "parallel" axis can feed both v7x cores.
        tp = min(tp, max(8, ((Np + 1) // 2) // 8 * 8))
    if tp < Np:
        tp = max(8, (tp // 8) * 8)                     # sublane-aligned tile
        Np_pad = pl.cdiv(Np, tp) * tp
    else:
        tp = Np                                        # single full-extent tile
        Np_pad = Np
    N_pad = Np_pad * pack

    if N_pad != N:                                     # ragged N: zero-pad, slice off below
        x = jnp.concatenate([x, jnp.zeros((N_pad - N, F), x.dtype)], axis=0)
    xp = x.reshape(Np_pad, pack * F)                   # row-major -> free repack

    # Fused, pre-scaled block-diagonal weights: [kron(I,W); kron(I,B)] / F.
    eye = jnp.eye(pack, dtype=jnp.float32)
    inv_f = 1.0 / F
    wb = jnp.concatenate(
        [jnp.kron(eye, w.astype(jnp.float32)) * inv_f,
         jnp.kron(eye, b.astype(jnp.float32)) * inv_f],
        axis=0)                                        # (2*pack*F, pack*O)

    grid = (Np_pad // tp,)
    out_packed = pl.pallas_call(
        nan_emb_kernel,
        out_shape=jax.ShapeDtypeStruct((Np_pad, pack * O), out_dtype),
        grid_spec=pltpu.PrefetchScalarGridSpec(
            num_scalar_prefetch=0,
            grid=grid,
            in_specs=[
                # x tile
                pl.BlockSpec((tp, pack * F), lambda i: (i, 0)),
                # resident fused [W;B] (constant index_map -> fetched once).
                # TODO(synk): pl.Buffered(1) single-buffering skipped; operand is tiny here.
                pl.BlockSpec((K, pack * O), lambda i: (0, 0)),
            ],
            out_specs=pl.BlockSpec((tp, pack * O), lambda i: (i, 0)),  # lane-dense output
        ),
        compiler_params=pltpu.CompilerParams(
            dimension_semantics=("parallel",),
            vmem_limit_bytes=int(vmem_limit),
        ),
    )(xp, wb)

    # Packed row-major layout == logical (N, O) row-major layout.
    return out_packed.reshape(N_pad, O)[:N]


def nan_emb_ref(x, w, b):
    # Exact torch semantics: per-feature affine, nan_to_num, mean over features.
    t = x[:, :, None] * w[None, :, :] + b[None, :, :]
    t = jnp.nan_to_num(t)
    return jnp.mean(t, axis=1)


if __name__ == "__main__":
    in_size = 4       # one Linear(1, out_size) per feature
    out_size = 32
    batch, seq = 2, 8

    key = jax.random.PRNGKey(0)
    kx, kw, kb = jax.random.split(key, 3)

    # "Parameters": W[i, o] = weight_i[o, 0], B[i, o] = bias_i[o]
    w = jax.random.normal(kw, (in_size, out_size), dtype=jnp.float32) * 0.5
    b = jax.random.normal(kb, (in_size, out_size), dtype=jnp.float32) * 0.1

    # Input with some NaNs to exercise the NaN masking.
    x = jax.random.normal(kx, (batch, seq, in_size), dtype=jnp.float32)
    x = x.at[0, 0, 1].set(jnp.nan)
    x = x.at[1, 3, 2].set(jnp.nan)

    x_flat = x.reshape(-1, in_size)            # module flattens all leading dims

    out = jax.block_until_ready(nan_emb(x_flat, w, b))
    ref = nan_emb_ref(x_flat, w, b)
    assert out.shape == (batch * seq, out_size)
    assert jnp.allclose(out, ref, atol=1e-5, rtol=1e-5)

    # Ragged / multi-grid-step case (exercises row padding and >1 pipelined step).
    x2 = jax.random.normal(jax.random.PRNGKey(1), (48, in_size), dtype=jnp.float32)
    x2 = x2.at[7, 0].set(jnp.nan)
    out2 = jax.block_until_ready(nan_emb(x2, w, b, block_rows=16))
    ref2 = nan_emb_ref(x2, w, b)
    assert out2.shape == (48, out_size)
    assert jnp.allclose(out2, ref2, atol=1e-5, rtol=1e-5)

    print("KERNEL_OK")
</pallas_src>

<mosaic_0001>
module attributes {stable_mosaic.version = 11 : i64} {
  func.func @nan_emb_kernel(%arg0: i32, %arg1: memref<4x16xf32, #tpu.memory_space<vmem>>, %arg2: memref<32x128xf32, #tpu.memory_space<vmem>>, %arg3: memref<4x128xf32, #tpu.memory_space<vmem>>) attributes {dimension_semantics = [#tpu.dimension_semantics<parallel>], iteration_bounds = array<i64: 1>, scalar_prefetch = 0 : i64, scratch_operands = 0 : i64, tpu.core_type = #tpu.core_type<tc>, window_params = [{transform_indices = @transform_0, window_bounds = array<i64: 4, 16>}, {pipeline_mode = #tpu.pipeline_mode<synchronous>, transform_indices = @transform_1, window_bounds = array<i64: 32, 128>}, {transform_indices = @transform_2, window_bounds = array<i64: 4, 128>}]} {
    %c0 = arith.constant 0 : index
    %c0_0 = arith.constant 0 : index
    %0 = vector.load %arg1[%c0, %c0_0] : memref<4x16xf32, #tpu.memory_space<vmem>>, vector<4x16xf32>
    %1 = arith.cmpf one, %0, %0 : vector<4x16xf32>
    %cst = arith.constant 0.000000e+00 : f32
    %2 = vector.broadcast %cst : f32 to vector<4x16xf32>
    %3 = arith.select %1, %2, %0 : vector<4x16xi1>, vector<4x16xf32>
    %cst_1 = arith.constant 0.000000e+00 : f32
    %4 = vector.broadcast %cst_1 : f32 to vector<4x16xf32>
    %cst_2 = arith.constant 1.000000e+00 : f32
    %5 = vector.broadcast %cst_2 : f32 to vector<4x16xf32>
    %6 = arith.select %1, %4, %5 : vector<4x16xi1>, vector<4x16xf32>
    %7 = tpu.concatenate %3, %6 in 1 : vector<4x16xf32>, vector<4x16xf32> -> vector<4x32xf32>
    %c0_3 = arith.constant 0 : index
    %c0_4 = arith.constant 0 : index
    %8 = vector.load %arg2[%c0_3, %c0_4] : memref<32x128xf32, #tpu.memory_space<vmem>>, vector<32x128xf32>
    %cst_5 = arith.constant dense<0.000000e+00> : vector<4x128xf32>
    %9 = tpu.matmul %7, %8, %cst_5 {dimension_numbers = #tpu.dot_dimension_numbers<[1], [0], [0], [1], [0, 0, 1, 1], [], []>} : vector<4x32xf32>, vector<32x128xf32>, vector<4x128xf32> -> vector<4x128xf32>
    %c0_6 = arith.constant 0 : index
    %c0_7 = arith.constant 0 : index
    %10 = vector.load %arg3[%c0_6, %c0_7] : memref<4x128xf32, #tpu.memory_space<vmem>>, vector<4x128xf32>
    tpu.vector_store %arg3[%c0_6, %c0_7], %9 {strides = array<i32>} : memref<4x128xf32, #tpu.memory_space<vmem>>, vector<4x128xf32>,
    return
  }
  func.func @transform_0(%arg0: i32) -> (i32, i32) {
    %c0_i32 = arith.constant 0 : i32
    %c0_i32_0 = arith.constant 0 : i32
    return %arg0, %c0_i32 : i32, i32
  }
  func.func @transform_1(%arg0: i32) -> (i32, i32) {
    %c0_i32 = arith.constant 0 : i32
    %c0_i32_0 = arith.constant 0 : i32
    %c0_i32_1 = arith.constant 0 : i32
    return %c0_i32, %c0_i32_0 : i32, i32
  }
  func.func @transform_2(%arg0: i32) -> (i32, i32) {
    %c0_i32 = arith.constant 0 : i32
    %c0_i32_0 = arith.constant 0 : i32
    return %arg0, %c0_i32 : i32, i32
  }
}

</mosaic_0001>

<bundles_post_ra>
// kernel: tpu_custom_call.1
= control target key start
LH: loop header
LB: loop body
LE: loop exit
PB: predicated region body
PF: predicated region fallthrough
CT: control target
= control target key end

     0   :  { %7 = vsyncpa [#allocation3], 0  ;;  %s216_s0 = inlined_call_operand.hbm [shape: f32[4,16], index: 0, kind: input, shape index: {}]   ;;  %s217_s1 = inlined_call_operand.hbm [shape: f32[32,128], index: 1, kind: input, shape index: {}]   ;;  %s218_s2 = inlined_call_operand.hbm [shape: f32[4,128], index: 2, kind: output, shape index: {}]  }
   0x1   :  { %8 = vsyncpa [#allocation6], 0 }
   0x2   :  { %9 = vsyncpa [#allocation4], 0  ;;  %s15_s11 = sshll.u32 %s216_s0, 4  ;;  %s185_s12 = smov [#allocation2]   ;;  %s16_s11 = int_to_ptr.hbm [resolvable:$true] %s15_s11 }
   0x3   :  { %s17_s13 = sshll.u32 %s185_s12, 4  ;;  %s25_s16 = sshll.u32 %s217_s1, 4  ;;  %s18_s13 = int_to_ptr.vmem [resolvable:$true] %s17_s13  ;;  %s26_s16 = int_to_ptr.hbm [resolvable:$true] %s25_s16 }
   0x4   :  { %20 = dma.hbm_to_vmem [thread:$0]  %s16_s11, 64, %s18_s13, [#allocation3]  }
   0x5   :  { %s186_s17 = smov [#allocation5]   ;;  %s187_s19 = smov 128  }
   0x6   :  { %s27_s18 = sshll.u32 %s186_s17, 4  ;;  %s188_s20 = smov 8   ;;  %s28_s18 = int_to_ptr.vmem [resolvable:$true] %s27_s18 }
   0x7   :  { %33 = dma.hbm_to_vmem [thread:$0]  %s26_s16, 512, %s28_s18, [#allocation6], %s187_s19, %s187_s19, %s188_s20  }
   0x8   :  { %179 = dma.done.wait [#allocation3], 64  }
   0x9   :  { %180 = vsyncadd [#allocation3], 4294967232 }
   0xa   :  { %181 = dma.done.wait [#allocation6], 512  }
   0xb   :  { %182 = vsyncadd [#allocation6], 4294966784  ;;  %v42_v0 = vld [vmem:[#allocation2] sm:$0xf]  ;;  %v54_v2 = vld [vmem:[#allocation5 + $0x10] sm:$0xff]  ;;  %v189_v4 = vmov 1.0  }
   0xc   :  { %v55_v1 = vld [vmem:[#allocation5 + $0x18] sm:$0xff]  ;;  %vm43_vm0 = vcmp.ne.f32.partialorder %v42_v0, %v42_v0  ;;  %v53_v6 = vld [vmem:[#allocation5 + $0x8] sm:$0xff]  ;;  %s190_s0 = smov 16   ;;  %v52_v7 = vld [vmem:[#allocation5] sm:$0xff]  ;;  %vm50_vm1 = vcmask 130048   ;;  %vm56_vm2 = vcmask 261120  }
   0xd   :  { %72 = vmatpush.msra.mxu0 %v55_v1  ;;  %v44_v3 = vsel %vm43_vm0, 0.0, %v42_v0  ;;  %v45_v5 = vsel %vm43_vm0, 0.0, %v189_v4  ;;  %s191_s1 = smov [#allocation7]   ;;  %s88_s24 = sshll.u32 %s218_s2, 4  ;;  %s89_s24 = int_to_ptr.hbm [resolvable:$true] %s88_s24 }
   0xe   :  { %47 = vrot.lane.b32.xlu0 %v45_v5, %s190_s0  ;;  %s86_s21 = sshll.u32 %s191_s1, 4  ;;  %s87_s21 = int_to_ptr.vmem [resolvable:$true] %s86_s21 }
   0xf   :  { %73 = vmatpush.msra.mxu0 %v54_v2 }
  0x11   :  { %74 = vmatpush.msra.mxu0 %v53_v6 }
  0x13   :  { %75 = vmatpush.msra.mxu0 %v52_v7 }
  0x80   :  { %v48_v8 = vpop.permute.xlu0 %47 }
  0x81   :  { %v51_v9 = vsel %vm50_vm1, %v44_v3, %v48_v8 }
  0x82   :  { %99 = vmatmul.msk.f32.vlgmr.msra.gmra.mxu0 %vm56_vm2, %v51_v9 }
  0xff   :  { %v77_v10 = vpop.f32.mrf.mxu0 }
 0x100   :  { %80 = vst [vmem:[#allocation7] sm:$0xf] %v77_v10 }
 0x101   :  { %91 = dma.vmem_to_hbm [thread:$0]  %s87_s21, 64, %s89_s24, [#allocation4]  }
 0x102   :  { %183 = dma.done.wait [#allocation4], 64  }
 0x103   :  { %184 = vsyncadd [#allocation4], 4294967232 }
 0x104   :  { %96 = vsyncpa [#allocation3], 1 }
 0x105   :  { %97 = vsyncpa [#allocation6], 1 }
 0x106   :  { %98 = vsyncpa [#allocation4], 1 }

</bundles_post_ra>
